<compile_context>
chip_gen: v7x
topology: tpu7x:2x2x1
jax: 0.10.0
libtpu: 0.0.40
codegen_flags: <defaults>
</compile_context>

<pallas_src>
import numpy as np
import jax
import jax.numpy as jnp
from jax.experimental import pallas as pl
from jax.experimental.pallas import tpu as pltpu


# ----------------------------------------------------------------------------
# Host-side glue: pooling / interpolation matrices (exact PyTorch semantics)
# ----------------------------------------------------------------------------
def _round_up(x: int, m: int) -> int:
    return ((x + m - 1) // m) * m


def adaptive_pool_matrix(out_size: int, in_size: int) -> np.ndarray:
    """Row i averages x[start:end] with start=floor(i*in/out), end=ceil((i+1)*in/out)."""
    m = np.zeros((out_size, in_size), dtype=np.float32)
    for i in range(out_size):
        start = (i * in_size) // out_size
        end = -(-((i + 1) * in_size) // out_size)  # ceil
        m[i, start:end] = 1.0 / (end - start)
    return m


def bilinear_upsample_matrix(out_size: int, in_size: int, align_corners: bool) -> np.ndarray:
    """Matches torch.nn.functional.interpolate(mode='bilinear') 1-D weights."""
    m = np.zeros((out_size, in_size), dtype=np.float32)
    for i in range(out_size):
        if align_corners:
            src = i * (in_size - 1) / (out_size - 1) if out_size > 1 else 0.0
        else:
            src = (i + 0.5) * in_size / out_size - 0.5
            src = max(src, 0.0)
        i0 = min(int(np.floor(src)), in_size - 1)
        i1 = min(i0 + 1, in_size - 1)
        frac = src - i0
        m[i, i0] += 1.0 - frac
        m[i, i1] += frac
    return m


def _choose_hw_tile(hw: int, max_tile: int = 2048) -> int:
    """Largest divisor of hw that is a multiple of 128 and <= max_tile, else hw."""
    if hw <= max_tile:
        return hw
    for t in range(max_tile, 0, -128):
        if hw % t == 0:
            return t
    return hw


# ----------------------------------------------------------------------------
# Stage 1: fused adaptive-avg-pool (all scales) as one matmul, tiled over HW
# ----------------------------------------------------------------------------
def _pool_kernel(x_ref, pmatT_ref, z_ref, acc_ref):
    t = pl.program_id(1)

    @pl.when(t == 0)
    def _():
        acc_ref[...] = jnp.zeros_like(acc_ref)

    acc_ref[...] += jnp.dot(x_ref[0], pmatT_ref[...],
                            preferred_element_type=jnp.float32)

    @pl.when(t == pl.num_programs(1) - 1)
    def _():
        z_ref[0] = acc_ref[...].astype(z_ref.dtype)


def _pool_call(x_flat, pmatT, hw_tile):
    N, C_in, HW = x_flat.shape
    SSp = pmatT.shape[1]
    assert HW % hw_tile == 0
    T = HW // hw_tile
    isz = np.dtype(x_flat.dtype).itemsize
    blk = (C_in * hw_tile + hw_tile * SSp + C_in * SSp) * isz
    vmem = min(max(3 * blk + 2 * C_in * SSp * 4 + (8 << 20), 32 << 20), 64 << 20)
    return pl.pallas_call(
        _pool_kernel,
        out_shape=jax.ShapeDtypeStruct((N, C_in, SSp), x_flat.dtype),
        grid_spec=pltpu.PrefetchScalarGridSpec(
            num_scalar_prefetch=0,
            grid=(N, T),
            in_specs=[
                pl.BlockSpec((1, C_in, hw_tile), lambda n, t: (n, 0, t)),
                pl.BlockSpec((hw_tile, SSp), lambda n, t: (t, 0)),
            ],
            out_specs=pl.BlockSpec((1, C_in, SSp), lambda n, t: (n, 0, 0)),
            scratch_shapes=[pltpu.VMEM((C_in, SSp), jnp.float32)],
        ),
        compiler_params=pltpu.CompilerParams(
            dimension_semantics=("parallel", "arbitrary"),
            vmem_limit_bytes=int(vmem)),
    )(x_flat, pmatT)


# ----------------------------------------------------------------------------
# Stage 2: 1x1 conv (BN folded) + shift + ReLU + bilinear upsample, tiled
# over (batch, scale, HW-output-tile), all parallel.
# ----------------------------------------------------------------------------
def _conv_upsample_kernel(z_ref, w_ref, shift_ref, umatT_ref, o_ref):
    # conv on the 128-lane pooled slab (recomputed per output tile: cheap)
    c = jnp.dot(w_ref[0], z_ref[0], preferred_element_type=jnp.float32)   # (C_out, SSp)
    y = jnp.maximum(c + shift_ref[0], 0.0)                                # BN shift + ReLU
    # rows of umatT outside this scale's pooled columns are exactly zero,
    # so the "garbage" lanes of y contribute nothing.
    o_ref[0, 0] = jnp.dot(y.astype(umatT_ref.dtype), umatT_ref[0],
                          preferred_element_type=jnp.float32)             # (C_out, hw_tile)


def _conv_upsample_call(z, w_stack, shift_stack, umatT_stack, HW, hw_tile):
    N, C_in, SSp = z.shape
    S, C_out, _ = w_stack.shape
    assert HW % hw_tile == 0
    T = HW // hw_tile
    isz = np.dtype(z.dtype).itemsize
    blk = ((C_in * SSp + C_out * C_in + SSp * hw_tile) * isz
           + C_out * 4 + C_out * hw_tile * 4)
    vmem = min(max(3 * blk + (8 << 20), 32 << 20), 64 << 20)
    return pl.pallas_call(
        _conv_upsample_kernel,
        out_shape=jax.ShapeDtypeStruct((S, N, C_out, HW), jnp.float32),
        grid_spec=pltpu.PrefetchScalarGridSpec(
            num_scalar_prefetch=0,
            grid=(N, S, T),
            in_specs=[
                pl.BlockSpec((1, C_in, SSp), lambda n, s, t: (n, 0, 0)),
                pl.BlockSpec((1, C_out, C_in), lambda n, s, t: (s, 0, 0)),
                pl.BlockSpec((1, C_out, 1), lambda n, s, t: (s, 0, 0)),
                pl.BlockSpec((1, SSp, hw_tile), lambda n, s, t: (s, 0, t)),
            ],
            out_specs=pl.BlockSpec((1, 1, C_out, hw_tile),
                                   lambda n, s, t: (s, n, 0, t)),
        ),
        compiler_params=pltpu.CompilerParams(
            dimension_semantics=("parallel", "parallel", "parallel"),
            vmem_limit_bytes=int(vmem)),
    )(z, w_stack, shift_stack, umatT_stack)


# ----------------------------------------------------------------------------
# Module wrapper
# ----------------------------------------------------------------------------
class UperNetPyramidPoolingModulePallas:
    def __init__(self, pool_scales, in_channels, channels, align_corners, key,
                 compute_dtype=jnp.float32):
        self.pool_scales = tuple(pool_scales)
        self.in_channels = in_channels
        self.channels = channels
        self.align_corners = align_corners
        self.compute_dtype = compute_dtype
        self.eps = 1e-5
        self.params = []
        for _ in pool_scales:
            key, k1, k2, k3, k4, k5 = jax.random.split(key, 6)
            w = jax.random.normal(k1, (channels, in_channels), jnp.float32) * 0.1
            gamma = 1.0 + 0.1 * jax.random.normal(k2, (channels,), jnp.float32)
            beta = 0.1 * jax.random.normal(k3, (channels,), jnp.float32)
            running_mean = 0.1 * jax.random.normal(k4, (channels,), jnp.float32)
            running_var = jnp.abs(jax.random.normal(k5, (channels,), jnp.float32)) + 0.5
            self.params.append((w, gamma, beta, running_mean, running_var))

    def __call__(self, x):
        """x: (N, C_in, H, W) float32 -> list of (N, channels, H, W)."""
        N, C_in, H, W = x.shape
        HW = H * W
        cdt = self.compute_dtype
        isz = np.dtype(cdt).itemsize
        mult = 8 * (4 // isz)                      # sublane pack: 8 (f32) / 16 (bf16)
        C_in_p = _round_up(C_in, mult)
        C_out = self.channels
        C_out_p = _round_up(C_out, mult)
        S = len(self.pool_scales)
        ss_total = sum(s * s for s in self.pool_scales)
        SSp = _round_up(ss_total, 128)             # all scales' pooled columns, padded
        hw_tile = _choose_hw_tile(HW)

        # --- host-side constants (tiny, built once per call) ----------------
        pmatT = np.zeros((HW, SSp), np.float32)    # fused pooling matrix (all scales)
        umatT = np.zeros((S, SSp, HW), np.float32) # per-scale upsample matrix
        off = 0
        for i, scale in enumerate(self.pool_scales):
            ss = scale * scale
            Ph = adaptive_pool_matrix(scale, H)
            Pw = adaptive_pool_matrix(scale, W)
            pmatT[:, off:off + ss] = np.kron(Ph, Pw).T
            Uh = bilinear_upsample_matrix(H, scale, self.align_corners)
            Uw = bilinear_upsample_matrix(W, scale, self.align_corners)
            umatT[i, off:off + ss, :] = np.kron(Uh, Uw).T
            off += ss

        # BN(eval) scale folded into the conv weight; only shift stays in-kernel.
        w_stack = np.zeros((S, C_out_p, C_in_p), np.float32)
        shift_stack = np.zeros((S, C_out_p, 1), np.float32)
        for i, (w, gamma, beta, mean, var) in enumerate(self.params):
            bn_scale = np.asarray(gamma) / np.sqrt(np.asarray(var) + self.eps)
            w_stack[i, :C_out, :C_in] = bn_scale[:, None] * np.asarray(w)
            shift_stack[i, :C_out, 0] = np.asarray(beta) - np.asarray(mean) * bn_scale

        x_flat = x.reshape(N, C_in, HW)
        if C_in_p != C_in:
            x_flat = jnp.pad(x_flat, ((0, 0), (0, C_in_p - C_in), (0, 0)))
        x_flat = x_flat.astype(cdt)

        # Stage 1: x read from HBM once, pooled for all scales simultaneously.
        z = _pool_call(x_flat, jnp.asarray(pmatT, dtype=cdt), hw_tile)
        # Stage 2: per-(batch, scale, output tile) conv+BN+ReLU+upsample.
        out = _conv_upsample_call(z,
                                  jnp.asarray(w_stack, dtype=cdt),
                                  jnp.asarray(shift_stack, dtype=jnp.float32),
                                  jnp.asarray(umatT, dtype=cdt),
                                  HW, hw_tile)
        return [out[i, :, :C_out, :].reshape(N, C_out, H, W) for i in range(S)]

    def reference(self, x):
        """Pure-JAX reference (same math, no Pallas) for verification."""
        N, C_in, H, W = x.shape
        outs = []
        for scale, (w, gamma, beta, mean, var) in zip(self.pool_scales, self.params):
            Ph = jnp.asarray(adaptive_pool_matrix(scale, H))
            Pw = jnp.asarray(adaptive_pool_matrix(scale, W))
            Uh = jnp.asarray(bilinear_upsample_matrix(H, scale, self.align_corners))
            Uw = jnp.asarray(bilinear_upsample_matrix(W, scale, self.align_corners))
            pooled = jnp.einsum("ph,nchw,qw->ncpq", Ph, x, Pw)
            conv = jnp.einsum("oc,ncpq->nopq", w, pooled)
            bn_scale = gamma / jnp.sqrt(var + self.eps)
            bn_shift = beta - mean * bn_scale
            y = jnp.maximum(conv * bn_scale[None, :, None, None]
                            + bn_shift[None, :, None, None], 0.0)
            up = jnp.einsum("ip,nopq,jq->noij", Uh, y, Uw)
            outs.append(up)
        return outs


if __name__ == "__main__":
    key = jax.random.PRNGKey(0)
    key, kx, kp = jax.random.split(key, 3)

    N, C_in, H, W = 2, 4, 16, 16
    channels = 8
    pool_scales = (1, 2, 3, 6)
    align_corners = False

    x = jax.random.normal(kx, (N, C_in, H, W), jnp.float32)

    # float32 compute path: tight check against the pure-JAX reference.
    module = UperNetPyramidPoolingModulePallas(
        pool_scales, C_in, channels, align_corners, kp)
    outs = [jax.block_until_ready(o) for o in module(x)]
    refs = module.reference(x)
    for o, r in zip(outs, refs):
        assert o.shape == (N, channels, H, W)
        np.testing.assert_allclose(np.asarray(o), np.asarray(r), rtol=1e-4, atol=1e-4)

    # bfloat16 compute path (MXU-friendly on v5e/v6e/v7x): loose check.
    module_bf16 = UperNetPyramidPoolingModulePallas(
        pool_scales, C_in, channels, align_corners, kp, compute_dtype=jnp.bfloat16)
    outs_bf16 = [jax.block_until_ready(o) for o in module_bf16(x)]
    for o, r in zip(outs_bf16, refs):
        assert o.shape == (N, channels, H, W)
        np.testing.assert_allclose(np.asarray(o), np.asarray(r), rtol=5e-2, atol=5e-2)

    print("KERNEL_OK")
</pallas_src>

<mosaic_0001>
module attributes {stable_mosaic.version = 11 : i64} {
  func.func @_pool_kernel(%arg0: i32, %arg1: i32, %arg2: memref<1x8x256xf32, #tpu.memory_space<vmem>>, %arg3: memref<256x128xf32, #tpu.memory_space<vmem>>, %arg4: memref<1x8x128xf32, #tpu.memory_space<vmem>>, %arg5: memref<8x128xf32, #tpu.memory_space<vmem>>) attributes {dimension_semantics = [#tpu.dimension_semantics<parallel>, #tpu.dimension_semantics<arbitrary>], iteration_bounds = array<i64: 2, 1>, scalar_prefetch = 0 : i64, scratch_operands = 1 : i64, tpu.core_type = #tpu.core_type<tc>, window_params = [{transform_indices = @transform_0, window_bounds = array<i64: 1, 8, 256>}, {transform_indices = @transform_1, window_bounds = array<i64: 256, 128>}, {transform_indices = @transform_2, window_bounds = array<i64: 1, 8, 128>}]} {
    %c0_i32 = arith.constant 0 : i32
    %0 = arith.cmpi eq, %arg1, %c0_i32 : i32
    %1 = arith.extui %0 : i1 to i32
    %c0_i32_0 = arith.constant 0 : i32
    %2 = arith.cmpi ne, %1, %c0_i32_0 : i32
    scf.if %2 {
      %cst_11 = arith.constant 0.000000e+00 : f32
      %13 = vector.broadcast %cst_11 : f32 to vector<8x128xf32>
      %c0_12 = arith.constant 0 : index
      %c0_13 = arith.constant 0 : index
      %14 = vector.load %arg5[%c0_12, %c0_13] : memref<8x128xf32, #tpu.memory_space<vmem>>, vector<8x128xf32>
      tpu.vector_store %arg5[%c0_12, %c0_13], %13 {strides = array<i32>} : memref<8x128xf32, #tpu.memory_space<vmem>>, vector<8x128xf32>,
    } else {
    }
    %c0 = arith.constant 0 : index
    %c0_1 = arith.constant 0 : index
    %3 = vector.load %arg5[%c0, %c0_1] : memref<8x128xf32, #tpu.memory_space<vmem>>, vector<8x128xf32>
    %c0_2 = arith.constant 0 : index
    %c0_3 = arith.constant 0 : index
    %c0_4 = arith.constant 0 : index
    %4 = vector.load %arg2[%c0_2, %c0_3, %c0_4] : memref<1x8x256xf32, #tpu.memory_space<vmem>>, vector<1x8x256xf32>
    %5 = vector.shape_cast %4 : vector<1x8x256xf32> to vector<8x256xf32>
    %c0_5 = arith.constant 0 : index
    %c0_6 = arith.constant 0 : index
    %6 = vector.load %arg3[%c0_5, %c0_6] : memref<256x128xf32, #tpu.memory_space<vmem>>, vector<256x128xf32>
    %cst = arith.constant dense<0.000000e+00> : vector<8x128xf32>
    %7 = tpu.matmul %5, %6, %cst {dimension_numbers = #tpu.dot_dimension_numbers<[1], [0], [0], [1], [0, 0, 1, 1], [], []>} : vector<8x256xf32>, vector<256x128xf32>, vector<8x128xf32> -> vector<8x128xf32>
    %8 = arith.addf %3, %7 : vector<8x128xf32>
    %c0_7 = arith.constant 0 : index
    %c0_8 = arith.constant 0 : index
    %9 = vector.load %arg5[%c0_7, %c0_8] : memref<8x128xf32, #tpu.memory_space<vmem>>, vector<8x128xf32>
    tpu.vector_store %arg5[%c0_7, %c0_8], %8 {strides = array<i32>} : memref<8x128xf32, #tpu.memory_space<vmem>>, vector<8x128xf32>,
    %c0_i32_9 = arith.constant 0 : i32
    %10 = arith.cmpi eq, %arg1, %c0_i32_9 : i32
    %11 = arith.extui %10 : i1 to i32
    %c0_i32_10 = arith.constant 0 : i32
    %12 = arith.cmpi ne, %11, %c0_i32_10 : i32
    scf.if %12 {
      %c0_11 = arith.constant 0 : index
      %c0_12 = arith.constant 0 : index
      %13 = vector.load %arg5[%c0_11, %c0_12] : memref<8x128xf32, #tpu.memory_space<vmem>>, vector<8x128xf32>
      %c0_13 = arith.constant 0 : index
      %c0_14 = arith.constant 0 : index
      %c0_15 = arith.constant 0 : index
      %14 = vector.load %arg4[%c0_13, %c0_14, %c0_15] : memref<1x8x128xf32, #tpu.memory_space<vmem>>, vector<1x8x128xf32>
      %15 = vector.shape_cast %14 : vector<1x8x128xf32> to vector<8x128xf32>
      %16 = vector.shape_cast %13 : vector<8x128xf32> to vector<1x8x128xf32>
      tpu.vector_store %arg4[%c0_13, %c0_14, %c0_15], %16 {strides = array<i32>} : memref<1x8x128xf32, #tpu.memory_space<vmem>>, vector<1x8x128xf32>,
    } else {
    }
    return
  }
  func.func @transform_0(%arg0: i32, %arg1: i32) -> (i32, i32, i32) {
    %c0_i32 = arith.constant 0 : i32
    %c0_i32_0 = arith.constant 0 : i32
    return %arg0, %c0_i32, %arg1 : i32, i32, i32
  }
  func.func @transform_1(%arg0: i32, %arg1: i32) -> (i32, i32) {
    %c0_i32 = arith.constant 0 : i32
    %c0_i32_0 = arith.constant 0 : i32
    return %arg1, %c0_i32 : i32, i32
  }
  func.func @transform_2(%arg0: i32, %arg1: i32) -> (i32, i32, i32) {
    %c0_i32 = arith.constant 0 : i32
    %c0_i32_0 = arith.constant 0 : i32
    %c0_i32_1 = arith.constant 0 : i32
    return %arg0, %c0_i32, %c0_i32_0 : i32, i32, i32
  }
}

</mosaic_0001>

<bundles_post_ra>
// kernel: tpu_custom_call.1
= control target key start
LH: loop header
LB: loop body
LE: loop exit
PB: predicated region body
PF: predicated region fallthrough
CT: control target
= control target key end

     0   :  { %7 = vsyncpa [#allocation4], 0  ;;  %s969_s0 = inlined_call_operand.hbm [shape: f32[2,8,256], index: 0, kind: input, shape index: {}]   ;;  %s970_s1 = inlined_call_operand.hbm [shape: f32[256,128], index: 1, kind: input, shape index: {}]   ;;  %s971_s2 = inlined_call_operand.hbm [shape: f32[2,8,128], index: 2, kind: output, shape index: {}]  }
   0x1   :  { %9 = vsyncpa [#allocation4 + $0x1], 0 }
   0x2   :  { %10 = vsyncpa [#allocation7], 0 }
   0x3   :  { %11 = vsyncpa [#allocation5], 0 }
   0x4   :  { %13 = vsyncpa [#allocation5 + $0x1], 0  ;;  %s750_s9 = smov 0   ;;  %s752_s10 = smov 0  }
   0x5   :  { %s754_s11 = smov 0   ;;  %s756_s12 = smov 0  }
   0x6   :  { %s758_s13 = smov 0   ;;  %s760_s14 = smov 0  }
   0x7 LB: > { %s425_s15 = sadd.s32 4294967295, %s728_s14   ;;  %s426_s16 = sadd.s32 4294967294, %s728_s14   ;;  %s728_s14 = sphi %s760_s14, %s19_s14   ;;  %s724_s13 = sphi %s758_s13, %s995_s13   ;;  %s720_s12 = sphi %s756_s12, %s994_s12   ;;  %s716_s11 = sphi %s754_s11, %s993_s11   ;;  %s712_s10 = sphi %s752_s10, %s992_s10   ;;  %s708_s9 = sphi %s750_s9, %s991_s9  }
   0x8   : > { %p53_p0 = scmp.ne.s32.totalorder %s712_s10, %s708_s9  ;;  %p784_p1 = scmp.eq.s32.totalorder %s425_s15, 0 }
   0x9   : > { %p788_p2 = scmp.eq.s32.totalorder %s425_s15, 1  ;;  %p109_p3 = scmp.eq.s32.totalorder %s426_s16, 1 }
   0xa   : > { %s976_s17 = scalar_select %p784_p1, 1, 0 }
   0xb   : > { %s977_s18 = scalar_select %p788_p2, 1, 0 }
   0xc   : > { %p794_p4 = por %p784_p1, %p53_p0  ;;  %p427_p5 = scmp.ge.s32.totalorder %s728_s14, 1 }
   0xd   : > { %p799_p6 = por %p109_p3, %p53_p0  ;;  %p116_p7 = scmp.lt.s32.totalorder %s728_s14, 3 }
   0xe   : > { %s978_s19 = scalar_select %p794_p4, 1, 0 }
   0xf   : > { %s979_s20 = scalar_select %p799_p6, 1, 0 }
  0x10   : > { %p804_p8 = pnand %p427_p5, %p116_p7  ;;  %s730_s22 = smov [#allocation6]  }
  0x11   : > { %s131_s23 = sshll.u32 %s730_s22, 4  ;;  %s31_s25 = sadd.s32 1, %s724_s13  ;;  %s132_s23 = int_to_ptr.vmem [resolvable:$true] %s131_s23 }
  0x12   : > { %s980_s21 = scalar_select %p804_p8, 1, 0 }
  0x13   : > { %p517_p9 = pneg %p804_p8  ;;  %s584_s28 = scalar_lea.hbm %s970_s1, 4096 }
  0x14   : > { %p585_p12 = scmp.ne.s32.totalorder %s970_s1, %s584_s28  ;;  %p591_p5 = scmp.lt.u32.totalorder %s584_s28, %s970_s1 }
  0x15   : > { %p813_p11 = pnand %p517_p9, %p784_p1 }
  0x17   : > { %p586_p13 = pneg %p813_p11 }
  0x19   : > { %p587_p0 = pnand %p586_p13, %p585_p12 }
  0x1b   : > { %p588_p3 = pneg %p587_p0 }
  0x1d   : > { %p593_p7 = pnand %p591_p5, %p588_p3 }
  0x1f   : > { %596 = shalt.err (!%p593_p7)
}
  0x20   : > { %s597_s5 = scalar_lea.vmem %s132_s23, 4096  ;;  %p605_p1 = scmp.lt.s32.totalorder %s132_s23, %s132_s23 }
  0x21   : > { %p598_p9 = scmp.ne.s32.totalorder %s132_s23, %s597_s5  ;;  %p606_p4 = scmp.lt.s32.totalorder %s597_s5, %s597_s5 }
  0x23   : > { %p600_p10 = pnand %p598_p9, %p586_p13  ;;  %p607_p8 = por %p606_p4, %p605_p1 }
  0x25   : > { %p601_p6 = pneg %p600_p10 }
  0x27   : > { %p608_p2 = pnand %p607_p8, %p601_p6 }
  0x29   : > { %611 = shalt.err (!%p608_p2)
}
  0x2a   : > { %s731_s6 = smov 128   ;;  %s732_s7 = smov 8  }
  0x2b   : > { %520 = dma.hbm_to_vmem [thread:$0]  (!%p813_p11), %s970_s1, 4096, %s132_s23, [#allocation7], %s731_s6, %s731_s6, %s732_s7  }
  0x2c   : > { %p33_p1 = scmp.ge.s32.totalorder %s31_s25, 2  ;;  %s40_s16 = sadd.s32 1, %s716_s11 }
  0x2d   : > { %p47_p2 = scmp.ne.s32.totalorder %s716_s11, %s712_s10  ;;  %p48_p4 = scmp.eq.s32.totalorder %s728_s14, 0 }
  0x2e   : > { %s997_s25 = smov (%p33_p1, %s31_s25), 0  ;;  %p983_p8 = scmp.ne.s32.totalorder %s977_s18, 0 }
  0x2f   : > { %p840_p6 = por %p48_p4, %p47_p2  ;;  %s35_s24 = ssub.s32 %s724_s13, %s997_s25 }
  0x30   : > { %p846_p10 = por %p983_p8, %p47_p2  ;;  %p530_p12 = scmp.lt.s32.totalorder %s728_s14, 2 }
  0x31   : > { %p38_p11 = scmp.eq.s32.totalorder %s35_s24, 0  ;;  %s145_s23 = sand.u32 1, %s716_s11  }
  0x32   : > { %s430_s27 = sshll.u32 %s145_s23, 4  ;;  %s441_s29 = sshll.u32 %s724_s13, 8 }
  0x33   : > { %s855_s28 = scalar_select %p38_p11, %s716_s11, %s40_s16  }
  0x34   : > { %s861_s4 = scalar_lea.hbm %s969_s0, %s441_s29  ;;  %s149_s18 = scalar_lea.vmem [#allocation3], %s430_s27 }
  0x35   : > { %s159_s5 = sshll.u32 %s149_s18, 4  ;;  %p867_p13 = pnand %p530_p12, %p840_p6  ;;  %s863_s5 = int_to_ptr.vmem [resolvable:$true] %s159_s5 }
  0x36   : > { %s146_s7 = scalar_lea.sflag [#allocation4], %s145_s23  ;;  %s612_s8 = scalar_lea.hbm %s861_s4, 256 }
  0x37   : > { %p613_p0 = scmp.ne.s32.totalorder %s861_s4, %s612_s8  ;;  %p614_p3 = pneg %p867_p13 }
  0x38   : > { %s617_s24 = scalar_lea.hbm %s969_s0, 512  ;;  %p618_p9 = scmp.lt.u32.totalorder %s861_s4, %s969_s0 }
  0x39   : > { %p615_p5 = pnand %p614_p3, %p613_p0  ;;  %p619_p1 = scmp.lt.u32.totalorder %s617_s24, %s612_s8 }
  0x3a   : > { %p621_p4 = scmp.lt.u32.totalorder %s612_s8, %s861_s4 }
  0x3b   : > { %p616_p7 = pneg %p615_p5  ;;  %p620_p2 = por %p619_p1, %p618_p9 }
  0x3d   : > { %p622_p6 = por %p621_p4, %p620_p2 }
  0x3f   : > { %p623_p8 = pnand %p622_p6, %p616_p7 }
  0x41   : > { %626 = shalt.err (!%p623_p8)
}
  0x42   : > { %s627_s23 = scalar_lea.vmem %s863_s5, 256  ;;  %s733_s29 = smov [#allocation3]  }
  0x43   : > { %p628_p12 = scmp.ne.s32.totalorder %s863_s5, %s627_s23  ;;  %s632_s30 = sshll.u32 %s733_s29, 4  ;;  %s633_s30 = int_to_ptr.vmem [resolvable:$false] %s632_s30 }
  0x44   : > { %s634_s3 = scalar_lea.vmem %s633_s30, 512  ;;  %p635_p5 = scmp.lt.s32.totalorder %s863_s5, %s633_s30 }
  0x45   : > { %p630_p11 = pnand %p628_p12, %p614_p3  ;;  %p636_p9 = scmp.lt.s32.totalorder %s634_s3, %s627_s23 }
  0x47   : > { %p631_p0 = pneg %p630_p11  ;;  %p637_p1 = por %p636_p9, %p635_p5 }
  0x49   : > { %p638_p2 = pnand %p637_p1, %p631_p0 }
  0x4b   : > { %641 = shalt.err (!%p638_p2)
}
  0x4c   : > { %524 = dma.hbm_to_vmem [thread:$0]  (!%p867_p13), %s861_s4, 256, %s863_s5, %s146_s7  }
  0x4d   : > { %p986_p7 = scmp.ne.s32.totalorder %s980_s21, 0 }
  0x4e   : > { %s899_s18 = sand.u32 (!%p986_p7), 1, %s712_s10   ;;  %p987_p3 = scmp.ne.s32.totalorder (!%p986_p7), %s978_s19, 0 }
  0x4f   : > { %168 = sbr.rel (%p986_p7) target bundleno = 354 (0x162), region = 28  ;;  %s434_s8 = sshll.u32 (!%p986_p7), %s899_s18, 4 }
  0x50   : > { %s171_s15 = scalar_lea.sflag (!%p986_p7), [#allocation4], %s899_s18  ;;  %s903_s16 = scalar_lea.vmem (!%p986_p7), [#allocation3], %s434_s8 }
  0x56   : > { %695 = dma.done.wait (%p987_p3), %s171_s15, 256  }
  0x57   : > { %697 = vsyncadd (%p987_p3), %s171_s15, 4294967040  ;;  %p988_p13 = scmp.ne.s32.totalorder %s976_s17, 0 }
  0x59   : > { %699 = dma.done.wait (%p988_p13), [#allocation7], 4096  }
  0x5a   : > { %701 = vsyncadd (%p988_p13), [#allocation7], 4294963200  ;;  %v225_v0 = vld [vmem:[#allocation6 + $0x80] sm:$0xff]  ;;  %v226_v1 = vld [vmem:[#allocation6 + $0x88] sm:$0xff]  ;;  %s436_s17 = sshll.u32 %s899_s18, 3  ;;  %s438_s19 = sshll.u32 %s720_s12, 7 }
  0x5b   : > { %v209_v2 = vld [vmem:[#allocation6] sm:$0xff]  ;;  %v477_v3 = vpack.c.bf16 %v226_v1, %v225_v0  ;;  %v210_v4 = vld [vmem:[#allocation6 + $0x8] sm:$0xff]  ;;  %v227_v5 = vld [vmem:[#allocation6 + $0x90] sm:$0xff]  ;;  %s198_s21 = scalar_lea.vmem [#allocation8], %s436_s17  ;;  %s920_s7 = scalar_lea.hbm %s971_s2, %s438_s19 }
  0x5c   : > { %v228_v6 = vld [vmem:[#allocation6 + $0x98] sm:$0xff]  ;;  %v479_v7 = vpack.c.bf16 %v210_v4, %v209_v2  ;;  %v211_v9 = vld [vmem:[#allocation6 + $0x10] sm:$0xff]  ;;  %v229_v11 = vld [vmem:[#allocation6 + $0xa0] sm:$0xff]  ;;  %s332_s4 = sshll.u32 %s198_s21, 4  ;;  %s319_s24 = scalar_lea.sflag [#allocation5], %s899_s18  ;;  %s922_s4 = int_to_ptr.vmem [resolvable:$true] %s332_s4 }
  0x5d   : > { %v481_v8 = vpack.c.bf16 %v228_v6, %v227_v5  ;;  %v212_v10 = vld [vmem:[#allocation6 + $0x18] sm:$0xff]  ;;  %478 = vmatprep.subr.bf16.mxu0 %v477_v3  ;;  %v230_v12 = vld [vmem:[#allocation6 + $0xa8] sm:$0xff]  ;;  %v213_v15 = vld [vmem:[#allocation6 + $0x20] sm:$0xff]  ;;  %s642_s22 = scalar_lea.vmem %s922_s4, 128  ;;  %s734_s12 = smov [#allocation8]  }
  0x5e   : > { %480 = vmatpush3.bf16.msra.mxu0 %v479_v7  ;;  %v483_v13 = vpack.c.bf16 %v212_v10, %v211_v9  ;;  %v485_v14 = vpack.c.bf16 %v230_v12, %v229_v11  ;;  %v214_v16 = vld [vmem:[#allocation6 + $0x28] sm:$0xff]  ;;  %v231_v17 = vld [vmem:[#allocation6 + $0xb0] sm:$0xff]  ;;  %v232_v18 = vld [vmem:[#allocation6 + $0xb8] sm:$0xff]  ;;  %p643_p4 = scmp.ne.s32.totalorder %s922_s4, %s642_s22  ;;  %s646_s27 = sshll.u32 %s734_s12, 4  ;;  %s647_s27 = int_to_ptr.vmem [resolvable:$false] %s646_s27 }
  0x5f   : > { %482 = vmatprep.subr.bf16.mxu0 %v481_v8  ;;  %v487_v19 = vpack.c.bf16 %v214_v16, %v213_v15  ;;  %v489_v20 = vpack.c.bf16 %v232_v18, %v231_v17  ;;  %v215_v21 = vld [vmem:[#allocation6 + $0x30] sm:$0xff]  ;;  %v216_v22 = vld [vmem:[#allocation6 + $0x38] sm:$0xff]  ;;  %v233_v23 = vld [vmem:[#allocation6 + $0xc0] sm:$0xff]  ;;  %s648_s23 = scalar_lea.vmem %s647_s27, 256  ;;  %p649_p12 = scmp.lt.s32.totalorder %s922_s4, %s647_s27 }
  0x60   : > { %v234_v24 = vld [vmem:[#allocation6 + $0xc8] sm:$0xff]  ;;  %v491_v26 = vpack.c.bf16 %v216_v22, %v215_v21  ;;  %v217_v28 = vld [vmem:[#allocation6 + $0x40] sm:$0xff]  ;;  %v235_v30 = vld [vmem:[#allocation6 + $0xd0] sm:$0xff]  ;;  %p644_p6 = pnand %p643_p4, %p846_p10  ;;  %p650_p11 = scmp.lt.s32.totalorder %s648_s23, %s642_s22 }
  0x61   : > { %v208_v25 = vld [vmem:[%s903_s16 + $0x8] sm:$0xff]  ;;  %v493_v27 = vpack.c.bf16 %v234_v24, %v233_v23  ;;  %v219_v34 = vld [vmem:[#allocation6 + $0x50] sm:$0xff]  ;;  %v237_v36 = vld [vmem:[#allocation6 + $0xe0] sm:$0xff] }
  0x62   : > { %484 = vmatpush3.bf16.msra.mxu0 %v483_v13  ;;  %305 = vmatprep.mubr.f32.mxu0 %v208_v25  ;;  %v218_v29 = vld [vmem:[#allocation6 + $0x48] sm:$0xff]  ;;  %v236_v31 = vld [vmem:[#allocation6 + $0xd8] sm:$0xff]  ;;  %v221_v40 = vld [vmem:[#allocation6 + $0x60] sm:$0xff]  ;;  %p645_p8 = pneg %p644_p6  ;;  %p651_p0 = por %p650_p11, %p649_p12 }
  0x63   : > { %486 = vmatprep.subr.bf16.mxu0 %v485_v14  ;;  %v495_v32 = vpack.c.bf16 %v218_v29, %v217_v28  ;;  %v497_v33 = vpack.c.bf16 %v236_v31, %v235_v30  ;;  %v220_v35 = vld [vmem:[#allocation6 + $0x58] sm:$0xff]  ;;  %v238_v37 = vld [vmem:[#allocation6 + $0xe8] sm:$0xff]  ;;  %v239_v42 = vld [vmem:[#allocation6 + $0xf0] sm:$0xff] }
  0x64   : > { %v499_v38 = vpack.c.bf16 %v220_v35, %v219_v34  ;;  %v501_v39 = vpack.c.bf16 %v238_v37, %v237_v36  ;;  %v222_v41 = vld [vmem:[#allocation6 + $0x68] sm:$0xff]  ;;  %v240_v43 = vld [vmem:[#allocation6 + $0xf8] sm:$0xff]  ;;  %v223_v46 = vld [vmem:[#allocation6 + $0x70] sm:$0xff]  ;;  %p652_p5 = pnand %p651_p0, %p645_p8 }
  0x65   : > { %v503_v44 = vpack.c.bf16 %v222_v41, %v221_v40  ;;  %v505_v45 = vpack.c.bf16 %v240_v43, %v239_v42  ;;  %v224_v47 = vld [vmem:[#allocation6 + $0x78] sm:$0xff]  ;;  %v207_v49 = vld [vmem:[%s903_s16] sm:$0xff] }
  0x66   : > { %488 = vmatpush3.bf16.msra.mxu0 %v487_v19  ;;  %v507_v48 = vpack.c.bf16 %v224_v47, %v223_v46 }
  0x67   : > { %490 = vmatprep.subr.bf16.mxu0 %v489_v20 }
  0x6a   : > { %492 = vmatpush3.bf16.msra.mxu0 %v491_v26 }
  0x6b   : > { %494 = vmatprep.subr.bf16.mxu0 %v493_v27 }
  0x6e   : > { %496 = vmatpush3.bf16.msra.mxu0 %v495_v32 }
  0x6f   : > { %498 = vmatprep.subr.bf16.mxu0 %v497_v33 }
  0x72   : > { %500 = vmatpush3.bf16.msra.mxu0 %v499_v38 }
  0x73   : > { %502 = vmatprep.subr.bf16.mxu0 %v501_v39 }
  0x76   : > { %504 = vmatpush3.bf16.msra.mxu0 %v503_v44 }
  0x77   : > { %506 = vmatprep.subr.bf16.mxu0 %v505_v45 }
  0x7a   : > { %508 = vmatpush3.bf16.msra.mxu0 %v507_v48 }
  0x7d   : > { %306 = vmatmul.mubr.f32.vlgmr.msra.gmra.mrb[0].mxu0 %v207_v49 }
 0x150   : > { %v474_v50 = vpop.f32.mrb[0].mxu0 }
 0x151   : > { %v475_v51 = vpop.f32.mrb[1].mxu0 }
 0x152   : > { %v476_v52 = vadd.f32 %v475_v51, %v474_v50 }
 0x154   : > { %317 = vst [vmem:[%s198_s21] sm:$0xff] %v476_v52 }
 0x155   : > { %655 = shalt.err (!%p652_p5)
}
 0x156   : > { %s656_s29 = scalar_lea.hbm %s920_s7, 128  ;;  %s660_s18 = scalar_lea.hbm %s971_s2, 256 }
 0x157   : > { %p657_p9 = scmp.ne.s32.totalorder %s920_s7, %s656_s29  ;;  %p661_p7 = scmp.lt.u32.totalorder %s920_s7, %s971_s2 }
 0x158   : > { %p662_p3 = scmp.lt.u32.totalorder %s660_s18, %s656_s29  ;;  %p664_p4 = scmp.lt.u32.totalorder %s656_s29, %s920_s7 }
 0x159   : > { %p658_p1 = pnand %p657_p9, %p846_p10 }
 0x15a   : > { %p663_p13 = por %p662_p3, %p661_p7 }
 0x15b   : > { %p659_p2 = pneg %p658_p1 }
 0x15c   : > { %p665_p6 = por %p664_p4, %p663_p13 }
 0x15e   : > { %p666_p8 = pnand %p665_p6, %p659_p2 }
 0x160   : > { %669 = shalt.err (!%p666_p8)
}
 0x161   : > { %515 = dma.vmem_to_hbm [thread:$0]  (%p846_p10), %s922_s4, 128, %s920_s7, %s319_s24  }
 0x162 PF: > { %s344_s16 = sand.u32 1, %s708_s9   ;;  %p989_p12 = scmp.ne.s32.totalorder %s979_s20, 0 }
 0x163   : > { %p990_p11 = scmp.ge.s32.totalorder %s728_s14, 2  ;;  %s345_s17 = scalar_lea.sflag [#allocation5], %s344_s16 }
 0x165   : > { %p526_p0 = pnand %p990_p11, %p989_p12 }
 0x167   : > { %703 = dma.done.wait (!%p526_p0), %s345_s17, 128  }
 0x168   : > { %705 = vsyncadd (!%p526_p0), %s345_s17, 4294967168  ;;  %s19_s14 = sadd.s32 1, %s728_s14   ;;  %s991_s9 = smov %s712_s10 }
 0x169   : > { %p16_p5 = scmp.ge.s32.totalorder %s19_s14, 4   ;;  %s992_s10 = smov %s716_s11 }
 0x16a   : > { %s993_s11 = smov %s855_s28  ;;  %s994_s12 = smov %s724_s13 }
 0x16b   : > { %s995_s13 = smov %s997_s25  ;;  %18 = sbr.rel (!%p16_p5) target bundleno = 7 (0x7), region = 86 }
 0x172   :  { %350 = vsyncpa [#allocation4], 1 }
 0x173   :  { %352 = vsyncpa [#allocation4 + $0x1], 1 }
 0x174   :  { %353 = vsyncpa [#allocation7], 1 }
 0x175   :  { %354 = vsyncpa [#allocation5], 1 }
 0x176   :  { %356 = vsyncpa [#allocation5 + $0x1], 1 }

</bundles_post_ra>
